<compile_context>
chip_gen: v7x
topology: tpu7x:2x2x1
jax: 0.10.0
libtpu: 0.0.40
codegen_flags: <defaults>
</compile_context>

<pallas_src>
import functools

import jax
import jax.numpy as jnp
from jax.experimental import pallas as pl
from jax.experimental.pallas import tpu as pltpu

EPS = 1e-5  # PyTorch BatchNorm1d default

# Packed-vector row indices (rows of the (8, 256) packed f32 operand).
_ROW_G1, _ROW_B1 = 0, 1       # bn1 gamma/beta  (256 valid lanes)
_ROW_G2, _ROW_B2 = 2, 3       # bn2 gamma/beta  (128 valid lanes)
_ROW_G3, _ROW_B3 = 4, 5       # bn3 gamma/beta  (256 valid lanes)
_ROW_B4 = 6                   # linear4 bias    (output_size valid lanes)


def _bn_relu_fused(h, gamma, beta):
    """Training-mode BatchNorm1d + ReLU, fused scale/shift form (all f32).

    Single pass stats (sum / sum-of-squares) + folded affine:
        scale = gamma * rsqrt(var + eps)
        shift = beta - mean * scale
        out   = relu(h * scale + shift)
    rsqrt lowers to the EUP (separate bundle slot).
    """
    inv_b = 1.0 / h.shape[0]
    s1 = jnp.sum(h, axis=0, keepdims=True)
    s2 = jnp.sum(h * h, axis=0, keepdims=True)
    mean = s1 * inv_b
    # f32 single-pass variance; clamp tiny negative rounding residue before rsqrt.
    var = jnp.maximum(s2 * inv_b - mean * mean, 0.0)
    scale = gamma * jax.lax.rsqrt(var + EPS)
    shift = beta - mean * scale
    return jnp.maximum(h * scale + shift, 0.0)


def mlp_kernel(x_ref, w13_ref, w2_ref, w4_ref, vec_ref, o_ref, *, d_in):
    out_dim = o_ref.shape[-1]

    # Layer 1: (B, d_in) @ (d_in, 256). Pre-BN bias omitted (cancelled by BN mean-sub).
    h = jnp.dot(x_ref[...].astype(jnp.bfloat16), w13_ref[0:d_in, :],
                preferred_element_type=jnp.float32)
    h = _bn_relu_fused(h, vec_ref[_ROW_G1:_ROW_G1 + 1, :],
                       vec_ref[_ROW_B1:_ROW_B1 + 1, :])

    # Layer 2: (B, 256) @ (256, 128).
    h = jnp.dot(h.astype(jnp.bfloat16), w2_ref[...],
                preferred_element_type=jnp.float32)
    h = _bn_relu_fused(h, vec_ref[_ROW_G2:_ROW_G2 + 1, :128],
                       vec_ref[_ROW_B2:_ROW_B2 + 1, :128])

    # Layer 3: (B, 128) @ (128, 256) -- second half of the packed w1/w3 operand.
    h = jnp.dot(h.astype(jnp.bfloat16), w13_ref[d_in:d_in + 128, :],
                preferred_element_type=jnp.float32)
    h = _bn_relu_fused(h, vec_ref[_ROW_G3:_ROW_G3 + 1, :],
                       vec_ref[_ROW_B3:_ROW_B3 + 1, :])

    # Layer 4: (B, 256) @ (256, out) + b4, then tanh. Only this bias matters.
    h = jnp.dot(h.astype(jnp.bfloat16), w4_ref[...],
                preferred_element_type=jnp.float32)
    h = h + vec_ref[_ROW_B4:_ROW_B4 + 1, :out_dim]
    o_ref[...] = jnp.tanh(h)


def model_ga_forward(x, kernel_params):
    """x: (B, input_size) f32. kernel_params: (w13 bf16, w2 bf16, w4 bf16, packed_vec f32).

    Note: if the model is invoked on many inputs, stack them into one larger batch
    before calling (the kernel is launch-overhead dominated at small B) -- but only if
    the larger BN batch matches the training intent.
    """
    w13, w2, w4, packed_vec = kernel_params
    B, d_in = x.shape
    out_size = w4.shape[-1]
    vmem = pl.BlockSpec(memory_space=pltpu.MemorySpace.VMEM)
    return pl.pallas_call(
        functools.partial(mlp_kernel, d_in=d_in),
        out_shape=jax.ShapeDtypeStruct((B, out_size), jnp.float32),
        in_specs=[vmem] * 5,
        out_specs=vmem,
    )(x, w13, w2, w4, packed_vec)


def _pad_row(v, width=256):
    """(1, d) f32 -> (1, width) f32, zero padded."""
    row = jnp.zeros((1, width), jnp.float32)
    return row.at[0, : v.shape[1]].set(v[0])


def init_params(key, input_size, output_size):
    """Deterministic init mimicking the PyTorch module's parameter shapes.

    Returns (kernel_params, ref_params):
      kernel_params = (w13, w2, w4, packed_vec) where w13 is w1 and w3 concatenated on
                      the sublane axis in bf16 (stored as (in, out) = W.T), and
                      packed_vec is a (8, 256) f32 operand holding
                      [g1, be1, g2, be2, g3, be3, b4, 0].
      ref_params    = full f32 parameter tuple (including the cancelled b1/b2/b3) for
                      the reference forward pass. Reference weights are the bf16 weights
                      round-tripped to f32 so the comparison isolates kernel error.
    """
    # Packing / slicing assumptions (keep the kernel's static views valid).
    assert input_size % 16 == 0, "w1/w3 sublane pack boundary must be bf16-tile aligned"
    assert output_size <= 256, "packed b4 row and ':out_dim' lane slice assume <= 256"

    dims = [(input_size, 256), (256, 128), (128, 256), (256, output_size)]
    ws, bs, gammas, betas = [], [], [], []
    for li, (din, dout) in enumerate(dims):
        key, kw, kb = jax.random.split(key, 3)
        bound = float(din) ** -0.5
        ws.append(jax.random.uniform(kw, (din, dout), jnp.float32, -bound, bound))
        bs.append(jax.random.uniform(kb, (1, dout), jnp.float32, -bound, bound))
        if li < 3:  # BN follows the first three linears
            key, kg, kbe = jax.random.split(key, 3)
            gammas.append(1.0 + 0.1 * jax.random.normal(kg, (1, dout), jnp.float32))
            betas.append(0.1 * jax.random.normal(kbe, (1, dout), jnp.float32))

    ws_bf16 = [w.astype(jnp.bfloat16) for w in ws]
    ws_ref = [w.astype(jnp.float32) for w in ws_bf16]  # bf16 round-trip for reference

    # Pack w1 (in,256) and w3 (128,256) into one (in+128, 256) bf16 operand.
    w13 = jnp.concatenate([ws_bf16[0], ws_bf16[2]], axis=0)

    packed_vec = jnp.concatenate(
        [
            _pad_row(gammas[0]), _pad_row(betas[0]),
            _pad_row(gammas[1]), _pad_row(betas[1]),
            _pad_row(gammas[2]), _pad_row(betas[2]),
            _pad_row(bs[3]),
            jnp.zeros((1, 256), jnp.float32),  # pad to 8 sublanes
        ],
        axis=0,
    )

    kernel_params = (w13, ws_bf16[1], ws_bf16[3], packed_vec)
    ref_params = (
        ws_ref[0], bs[0], gammas[0], betas[0],
        ws_ref[1], bs[1], gammas[1], betas[1],
        ws_ref[2], bs[2], gammas[2], betas[2],
        ws_ref[3], bs[3],
    )
    return kernel_params, ref_params


def _bn_relu_ref(h, gamma, beta):
    """Plain two-pass training-mode BatchNorm1d + ReLU (reference math, f32)."""
    mean = jnp.mean(h, axis=0, keepdims=True)
    var = jnp.mean((h - mean) ** 2, axis=0, keepdims=True)
    hn = (h - mean) * jax.lax.rsqrt(var + EPS)
    return jnp.maximum(hn * gamma + beta, 0.0)


def reference_forward(x, ref_params):
    """Pure-JAX f32 reference matching the PyTorch module (training-mode BN).

    Note b1/b2/b3 ARE applied here; the kernel drops them because training-mode BN
    cancels pre-BN per-feature biases exactly.
    """
    (w1, b1, g1, be1, w2, b2, g2, be2, w3, b3, g3, be3, w4, b4) = ref_params
    h = x @ w1 + b1
    h = _bn_relu_ref(h, g1, be1)
    h = h @ w2 + b2
    h = _bn_relu_ref(h, g2, be2)
    h = h @ w3 + b3
    h = _bn_relu_ref(h, g3, be3)
    return jnp.tanh(h @ w4 + b4)


if __name__ == "__main__":
    key = jax.random.PRNGKey(0)
    key, kx = jax.random.split(key)

    batch, input_size, output_size = 8, 32, 16
    x = jax.random.normal(kx, (batch, input_size), jnp.float32)
    kernel_params, ref_params = init_params(key, input_size, output_size)

    out = jax.block_until_ready(model_ga_forward(x, kernel_params))

    ref = reference_forward(x, ref_params)
    assert out.shape == (batch, output_size)
    # bf16 weights/activations in the kernel vs f32 reference -> relaxed tolerance.
    assert jnp.allclose(out, ref, atol=3e-2, rtol=3e-2), (
        f"mismatch vs reference, max abs err = {float(jnp.max(jnp.abs(out - ref)))}"
    )

    print("KERNEL_OK")
</pallas_src>

<mosaic_0001>
module attributes {stable_mosaic.version = 11 : i64} {
  func.func @mlp_kernel(%arg0: memref<8x32xf32, #tpu.memory_space<vmem>>, %arg1: memref<160x256xbf16, #tpu.memory_space<vmem>>, %arg2: memref<256x128xbf16, #tpu.memory_space<vmem>>, %arg3: memref<256x16xbf16, #tpu.memory_space<vmem>>, %arg4: memref<8x256xf32, #tpu.memory_space<vmem>>, %arg5: memref<8x16xf32, #tpu.memory_space<vmem>>) attributes {dimension_semantics = [], scalar_prefetch = 0 : i64, scratch_operands = 0 : i64, tpu.core_type = #tpu.core_type<tc>} {
    %c0 = arith.constant 0 : index
    %c0_0 = arith.constant 0 : index
    %0 = vector.load %arg0[%c0, %c0_0] : memref<8x32xf32, #tpu.memory_space<vmem>>, vector<8x32xf32>
    %1 = arith.truncf %0 : vector<8x32xf32> to vector<8x32xbf16>
    %c0_1 = arith.constant 0 : index
    %c0_2 = arith.constant 0 : index
    %2 = vector.load %arg1[%c0_1, %c0_2] : memref<160x256xbf16, #tpu.memory_space<vmem>>, vector<32x256xbf16>
    %cst = arith.constant dense<0.000000e+00> : vector<8x256xf32>
    %3 = tpu.matmul %1, %2, %cst {dimension_numbers = #tpu.dot_dimension_numbers<[1], [0], [0], [1], [0, 0, 1, 1], [], []>} : vector<8x32xbf16>, vector<32x256xbf16>, vector<8x256xf32> -> vector<8x256xf32>
    %c0_3 = arith.constant 0 : index
    %c0_4 = arith.constant 0 : index
    %4 = vector.load %arg4[%c0_3, %c0_4] : memref<8x256xf32, #tpu.memory_space<vmem>>, vector<1x256xf32>
    %c1 = arith.constant 1 : index
    %c0_5 = arith.constant 0 : index
    %5 = vector.load %arg4[%c1, %c0_5] : memref<8x256xf32, #tpu.memory_space<vmem>>, vector<1x256xf32>
    %cst_6 = arith.constant dense<0.000000e+00> : vector<256xf32>
    %6 = vector.multi_reduction <add>, %3, %cst_6 [0] : vector<8x256xf32> to vector<256xf32>
    %7 = vector.shape_cast %6 : vector<256xf32> to vector<1x256xf32>
    %8 = arith.mulf %3, %3 : vector<8x256xf32>
    %cst_7 = arith.constant dense<0.000000e+00> : vector<256xf32>
    %9 = vector.multi_reduction <add>, %8, %cst_7 [0] : vector<8x256xf32> to vector<256xf32>
    %10 = vector.shape_cast %9 : vector<256xf32> to vector<1x256xf32>
    %cst_8 = arith.constant 1.250000e-01 : f32
    %11 = vector.broadcast %cst_8 : f32 to vector<1x256xf32>
    %12 = arith.mulf %7, %11 : vector<1x256xf32>
    %cst_9 = arith.constant 1.250000e-01 : f32
    %13 = vector.broadcast %cst_9 : f32 to vector<1x256xf32>
    %14 = arith.mulf %10, %13 : vector<1x256xf32>
    %15 = arith.mulf %12, %12 : vector<1x256xf32>
    %16 = arith.subf %14, %15 : vector<1x256xf32>
    %cst_10 = arith.constant 0.000000e+00 : f32
    %17 = vector.broadcast %cst_10 : f32 to vector<1x256xf32>
    %18 = arith.maximumf %16, %17 : vector<1x256xf32>
    %cst_11 = arith.constant 9.99999974E-6 : f32
    %19 = vector.broadcast %cst_11 : f32 to vector<1x256xf32>
    %20 = arith.addf %18, %19 : vector<1x256xf32>
    %21 = math.rsqrt %20 : vector<1x256xf32>
    %22 = arith.mulf %4, %21 : vector<1x256xf32>
    %23 = arith.mulf %12, %22 : vector<1x256xf32>
    %24 = arith.subf %5, %23 : vector<1x256xf32>
    %25 = vector.broadcast %22 : vector<1x256xf32> to vector<8x256xf32>
    %26 = arith.mulf %3, %25 : vector<8x256xf32>
    %27 = vector.broadcast %24 : vector<1x256xf32> to vector<8x256xf32>
    %28 = arith.addf %26, %27 : vector<8x256xf32>
    %cst_12 = arith.constant 0.000000e+00 : f32
    %29 = vector.broadcast %cst_12 : f32 to vector<8x256xf32>
    %30 = arith.maximumf %28, %29 : vector<8x256xf32>
    %31 = arith.truncf %30 : vector<8x256xf32> to vector<8x256xbf16>
    %c0_13 = arith.constant 0 : index
    %c0_14 = arith.constant 0 : index
    %32 = vector.load %arg2[%c0_13, %c0_14] : memref<256x128xbf16, #tpu.memory_space<vmem>>, vector<256x128xbf16>
    %cst_15 = arith.constant dense<0.000000e+00> : vector<8x128xf32>
    %33 = tpu.matmul %31, %32, %cst_15 {dimension_numbers = #tpu.dot_dimension_numbers<[1], [0], [0], [1], [0, 0, 1, 1], [], []>} : vector<8x256xbf16>, vector<256x128xbf16>, vector<8x128xf32> -> vector<8x128xf32>
    %c2 = arith.constant 2 : index
    %c0_16 = arith.constant 0 : index
    %34 = vector.load %arg4[%c2, %c0_16] : memref<8x256xf32, #tpu.memory_space<vmem>>, vector<1x128xf32>
    %c3 = arith.constant 3 : index
    %c0_17 = arith.constant 0 : index
    %35 = vector.load %arg4[%c3, %c0_17] : memref<8x256xf32, #tpu.memory_space<vmem>>, vector<1x128xf32>
    %cst_18 = arith.constant dense<0.000000e+00> : vector<128xf32>
    %36 = vector.multi_reduction <add>, %33, %cst_18 [0] : vector<8x128xf32> to vector<128xf32>
    %37 = vector.shape_cast %36 : vector<128xf32> to vector<1x128xf32>
    %38 = arith.mulf %33, %33 : vector<8x128xf32>
    %cst_19 = arith.constant dense<0.000000e+00> : vector<128xf32>
    %39 = vector.multi_reduction <add>, %38, %cst_19 [0] : vector<8x128xf32> to vector<128xf32>
    %40 = vector.shape_cast %39 : vector<128xf32> to vector<1x128xf32>
    %cst_20 = arith.constant 1.250000e-01 : f32
    %41 = vector.broadcast %cst_20 : f32 to vector<1x128xf32>
    %42 = arith.mulf %37, %41 : vector<1x128xf32>
    %cst_21 = arith.constant 1.250000e-01 : f32
    %43 = vector.broadcast %cst_21 : f32 to vector<1x128xf32>
    %44 = arith.mulf %40, %43 : vector<1x128xf32>
    %45 = arith.mulf %42, %42 : vector<1x128xf32>
    %46 = arith.subf %44, %45 : vector<1x128xf32>
    %cst_22 = arith.constant 0.000000e+00 : f32
    %47 = vector.broadcast %cst_22 : f32 to vector<1x128xf32>
    %48 = arith.maximumf %46, %47 : vector<1x128xf32>
    %cst_23 = arith.constant 9.99999974E-6 : f32
    %49 = vector.broadcast %cst_23 : f32 to vector<1x128xf32>
    %50 = arith.addf %48, %49 : vector<1x128xf32>
    %51 = math.rsqrt %50 : vector<1x128xf32>
    %52 = arith.mulf %34, %51 : vector<1x128xf32>
    %53 = arith.mulf %42, %52 : vector<1x128xf32>
    %54 = arith.subf %35, %53 : vector<1x128xf32>
    %55 = vector.broadcast %52 : vector<1x128xf32> to vector<8x128xf32>
    %56 = arith.mulf %33, %55 : vector<8x128xf32>
    %57 = vector.broadcast %54 : vector<1x128xf32> to vector<8x128xf32>
    %58 = arith.addf %56, %57 : vector<8x128xf32>
    %cst_24 = arith.constant 0.000000e+00 : f32
    %59 = vector.broadcast %cst_24 : f32 to vector<8x128xf32>
    %60 = arith.maximumf %58, %59 : vector<8x128xf32>
    %61 = arith.truncf %60 : vector<8x128xf32> to vector<8x128xbf16>
    %c32 = arith.constant 32 : index
    %c0_25 = arith.constant 0 : index
    %62 = vector.load %arg1[%c32, %c0_25] : memref<160x256xbf16, #tpu.memory_space<vmem>>, vector<128x256xbf16>
    %cst_26 = arith.constant dense<0.000000e+00> : vector<8x256xf32>
    %63 = tpu.matmul %61, %62, %cst_26 {dimension_numbers = #tpu.dot_dimension_numbers<[1], [0], [0], [1], [0, 0, 1, 1], [], []>} : vector<8x128xbf16>, vector<128x256xbf16>, vector<8x256xf32> -> vector<8x256xf32>
    %c4 = arith.constant 4 : index
    %c0_27 = arith.constant 0 : index
    %64 = vector.load %arg4[%c4, %c0_27] : memref<8x256xf32, #tpu.memory_space<vmem>>, vector<1x256xf32>
    %c5 = arith.constant 5 : index
    %c0_28 = arith.constant 0 : index
    %65 = vector.load %arg4[%c5, %c0_28] : memref<8x256xf32, #tpu.memory_space<vmem>>, vector<1x256xf32>
    %cst_29 = arith.constant dense<0.000000e+00> : vector<256xf32>
    %66 = vector.multi_reduction <add>, %63, %cst_29 [0] : vector<8x256xf32> to vector<256xf32>
    %67 = vector.shape_cast %66 : vector<256xf32> to vector<1x256xf32>
    %68 = arith.mulf %63, %63 : vector<8x256xf32>
    %cst_30 = arith.constant dense<0.000000e+00> : vector<256xf32>
    %69 = vector.multi_reduction <add>, %68, %cst_30 [0] : vector<8x256xf32> to vector<256xf32>
    %70 = vector.shape_cast %69 : vector<256xf32> to vector<1x256xf32>
    %cst_31 = arith.constant 1.250000e-01 : f32
    %71 = vector.broadcast %cst_31 : f32 to vector<1x256xf32>
    %72 = arith.mulf %67, %71 : vector<1x256xf32>
    %cst_32 = arith.constant 1.250000e-01 : f32
    %73 = vector.broadcast %cst_32 : f32 to vector<1x256xf32>
    %74 = arith.mulf %70, %73 : vector<1x256xf32>
    %75 = arith.mulf %72, %72 : vector<1x256xf32>
    %76 = arith.subf %74, %75 : vector<1x256xf32>
    %cst_33 = arith.constant 0.000000e+00 : f32
    %77 = vector.broadcast %cst_33 : f32 to vector<1x256xf32>
    %78 = arith.maximumf %76, %77 : vector<1x256xf32>
    %cst_34 = arith.constant 9.99999974E-6 : f32
    %79 = vector.broadcast %cst_34 : f32 to vector<1x256xf32>
    %80 = arith.addf %78, %79 : vector<1x256xf32>
    %81 = math.rsqrt %80 : vector<1x256xf32>
    %82 = arith.mulf %64, %81 : vector<1x256xf32>
    %83 = arith.mulf %72, %82 : vector<1x256xf32>
    %84 = arith.subf %65, %83 : vector<1x256xf32>
    %85 = vector.broadcast %82 : vector<1x256xf32> to vector<8x256xf32>
    %86 = arith.mulf %63, %85 : vector<8x256xf32>
    %87 = vector.broadcast %84 : vector<1x256xf32> to vector<8x256xf32>
    %88 = arith.addf %86, %87 : vector<8x256xf32>
    %cst_35 = arith.constant 0.000000e+00 : f32
    %89 = vector.broadcast %cst_35 : f32 to vector<8x256xf32>
    %90 = arith.maximumf %88, %89 : vector<8x256xf32>
    %91 = arith.truncf %90 : vector<8x256xf32> to vector<8x256xbf16>
    %c0_36 = arith.constant 0 : index
    %c0_37 = arith.constant 0 : index
    %92 = vector.load %arg3[%c0_36, %c0_37] : memref<256x16xbf16, #tpu.memory_space<vmem>>, vector<256x16xbf16>
    %cst_38 = arith.constant dense<0.000000e+00> : vector<8x16xf32>
    %93 = tpu.matmul %91, %92, %cst_38 {dimension_numbers = #tpu.dot_dimension_numbers<[1], [0], [0], [1], [0, 0, 1, 1], [], []>} : vector<8x256xbf16>, vector<256x16xbf16>, vector<8x16xf32> -> vector<8x16xf32>
    %c6 = arith.constant 6 : index
    %c0_39 = arith.constant 0 : index
    %94 = vector.load %arg4[%c6, %c0_39] : memref<8x256xf32, #tpu.memory_space<vmem>>, vector<1x16xf32>
    %95 = vector.broadcast %94 : vector<1x16xf32> to vector<8x16xf32>
    %96 = arith.addf %93, %95 : vector<8x16xf32>
    %97 = math.tanh %96 : vector<8x16xf32>
    %c0_40 = arith.constant 0 : index
    %c0_41 = arith.constant 0 : index
    %98 = vector.load %arg5[%c0_40, %c0_41] : memref<8x16xf32, #tpu.memory_space<vmem>>, vector<8x16xf32>
    tpu.vector_store %arg5[%c0_40, %c0_41], %97 {strides = array<i32>} : memref<8x16xf32, #tpu.memory_space<vmem>>, vector<8x16xf32>,
    return
  }
}

</mosaic_0001>

<bundles_post_ra>
// kernel: tpu_custom_call.1
= control target key start
LH: loop header
LB: loop body
LE: loop exit
PB: predicated region body
PF: predicated region fallthrough
CT: control target
= control target key end

     0   :  { %10 = vsyncpa [#allocation3], 0  ;;  %s1347_s0 = inlined_call_operand.hbm [shape: f32[8,32], index: 0, kind: input, shape index: {}]   ;;  %s1348_s1 = inlined_call_operand.hbm [shape: bf16[160,256], index: 1, kind: input, shape index: {}]   ;;  %s1349_s2 = inlined_call_operand.vmem [shape: bf16[256,128], index: 2, kind: input, shape index: {}]   ;;  %s1350_s3 = inlined_call_operand.vmem [shape: bf16[256,16], index: 3, kind: input, shape index: {}]   ;;  %s1351_s4 = inlined_call_operand.vmem [shape: f32[8,256], index: 4, kind: input, shape index: {}]   ;;  %s1352_s5 = inlined_call_operand.hbm [shape: f32[8,16], index: 5, kind: output, shape index: {}]  }
   0x1   :  { %11 = vsyncpa [#allocation6], 0 }
   0x2   :  { %12 = vsyncpa [#allocation4], 0  ;;  %s1121_s18 = smov [#allocation2]   ;;  %s1122_s20 = smov [#allocation5]  }
   0x3   :  { %s19_s19 = sshll.u32 %s1121_s18, 4  ;;  %s28_s21 = sshll.u32 %s1122_s20, 4  ;;  %s20_s19 = int_to_ptr.vmem [resolvable:$true] %s19_s19  ;;  %s1158_s21 = int_to_ptr.vmem [resolvable:$true] %s28_s21 }
   0x4   :  { %s1049_s24 = scalar_lea.hbm %s1347_s0, 128 }
   0x5   :  { %p1050_p0 = scmp.ne.s32.totalorder %s1347_s0, %s1049_s24  ;;  %p1053_p1 = scmp.lt.u32.totalorder %s1049_s24, %s1347_s0 }
   0x7   :  { %p1055_p2 = pnand %p1053_p1, %p1050_p0 }
   0x9   :  { %1058 = shalt.err (!%p1055_p2)
}
   0xa   :  { %s1059_s29 = scalar_lea.vmem %s20_s19, 128  ;;  %p1064_p4 = scmp.lt.s32.totalorder %s20_s19, %s20_s19 }
   0xb   :  { %p1060_p3 = scmp.ne.s32.totalorder %s20_s19, %s1059_s29  ;;  %p1065_p5 = scmp.lt.s32.totalorder %s1059_s29, %s1059_s29 }
   0xd   :  { %p1066_p6 = por %p1065_p5, %p1064_p4 }
   0xf   :  { %p1067_p7 = pnand %p1066_p6, %p1060_p3 }
  0x11   :  { %1070 = shalt.err (!%p1067_p7)
}
  0x12   :  { %22 = dma.hbm_to_vmem [thread:$0]  %s1347_s0, 128, %s20_s19, [#allocation3]  }
  0x13   :  { %s1071_s9 = scalar_lea.hbm %s1348_s1, 2560 }
  0x14   :  { %p1072_p8 = scmp.ne.s32.totalorder %s1348_s1, %s1071_s9  ;;  %p1075_p9 = scmp.lt.u32.totalorder %s1071_s9, %s1348_s1 }
  0x16   :  { %p1077_p10 = pnand %p1075_p9, %p1072_p8 }
  0x18   :  { %1080 = shalt.err (!%p1077_p10)
}
  0x19   :  { %s1081_s14 = scalar_lea.vmem %s1158_s21, 2560  ;;  %p1086_p12 = scmp.lt.s32.totalorder %s1158_s21, %s1158_s21 }
  0x1a   :  { %p1082_p11 = scmp.ne.s32.totalorder %s1158_s21, %s1081_s14  ;;  %p1087_p13 = scmp.lt.s32.totalorder %s1081_s14, %s1081_s14 }
  0x1c   :  { %p1088_p0 = por %p1087_p13, %p1086_p12 }
  0x1e   :  { %p1089_p1 = pnand %p1088_p0, %p1082_p11 }
  0x20   :  { %1092 = shalt.err (!%p1089_p1)
}
  0x21   :  { %s1123_s0 = smov 128   ;;  %s1124_s15 = smov 8  }
  0x22   :  { %34 = dma.hbm_to_vmem [thread:$0]  %s1348_s1, 2560, %s1158_s21, [#allocation6], %s1123_s0, %s1123_s0, %s1124_s15  }
  0x23   :  { %1115 = dma.done.wait [#allocation3], 128  }
  0x24   :  { %1116 = vsyncadd [#allocation3], 4294967168 }
  0x25   :  { %1117 = dma.done.wait [#allocation6], 2560  }
  0x26   :  { %1118 = vsyncadd [#allocation6], 4294964736  ;;  %v1125_v0 = vmov 0   ;;  %v975_v1 = vld [vmem:[#allocation5 + $0x4] ss:$8 sps:$4 sm:$0xff]   ;;  %v48_v5 = vld [vmem:[#allocation2] sm:$0xff] }
  0x27   :  { %110 = vmatprep.mubr.bf16.mxu0 %v1125_v0  ;;  %v977_v2 = vld [vmem:[#allocation5] ss:$8 sps:$4 sm:$0xff]   ;;  %78 = vmatprep.subr.bf16.mxu0 %v975_v1  ;;  %v978_v3 = vld [vmem:[#allocation5 + $0x14] ss:$8 sps:$4 sm:$0xff]   ;;  %v980_v4 = vld [vmem:[#allocation5 + $0x10] ss:$8 sps:$4 sm:$0xff]   ;;  %v49_v6 = vpack.c.bf16 %v48_v5, %v48_v5 }
  0x28   :  { %vm74_vm0 = vcmask 261120   ;;  %79 = vmatpush1.bf16.msra.mxu0 %v977_v2  ;;  %v981_v7 = vld [vmem:[%s1349_s2 + $0x40] sm:$0xff]   ;;  %v983_v9 = vld [vmem:[%s1349_s2 + $0x48] sm:$0xff]   ;;  %v985_v11 = vld [vmem:[%s1349_s2 + $0x50] sm:$0xff]   ;;  %v1126_v1 = vmov 1966171168  }
  0x29   :  { %80 = vmatprep.subr.bf16.mxu0 %v978_v3  ;;  %v982_v8 = vld [vmem:[%s1349_s2] sm:$0xff]   ;;  %924 = vmatprep.subr.bf16.mxu1 %v981_v7  ;;  %v984_v10 = vld [vmem:[%s1349_s2 + $0x8] sm:$0xff]   ;;  %v986_v12 = vld [vmem:[%s1349_s2 + $0x10] sm:$0xff]   ;;  %v166_v2 = vunpack.c.l.s4 %v1126_v1  ;;  %v168_v3 = vlaneseq  ;;  %s1127_s13 = smov [#allocation7]   ;;  %vm850_vm1 = vcmask 130048  }
  0x2a   :  { %925 = vmatpush3.bf16.msra.mxu1 %v982_v8  ;;  %v987_v13 = vld [vmem:[%s1349_s2 + $0x58] sm:$0xff]   ;;  %v989_v15 = vld [vmem:[%s1349_s2 + $0x60] sm:$0xff]   ;;  %v991_v17 = vld [vmem:[%s1349_s2 + $0x68] sm:$0xff]   ;;  %s858_s14 = sshll.u32 %s1127_s13, 4  ;;  %s859_s14 = int_to_ptr.vmem [resolvable:$true] %s858_s14 }
  0x2b   :  { %926 = vmatprep.subr.bf16.mxu1 %v983_v9  ;;  %v988_v14 = vld [vmem:[%s1349_s2 + $0x18] sm:$0xff]   ;;  %v990_v16 = vld [vmem:[%s1349_s2 + $0x20] sm:$0xff]   ;;  %v992_v18 = vld [vmem:[%s1349_s2 + $0x28] sm:$0xff]   ;;  %v169_v5 = vshrl.u32 %v168_v3, 7  ;;  %s1093_s0 = scalar_lea.vmem %s859_s14, 128  ;;  %p1098_p3 = scmp.lt.s32.totalorder %s859_s14, %s859_s14 }
  0x2c   :  { %81 = vmatpush1.bf16.msra.mxu0 %v980_v4  ;;  %v993_v19 = vld [vmem:[%s1349_s2 + $0x70] sm:$0xff]   ;;  %v995_v21 = vld [vmem:[%s1349_s2 + $0x78] sm:$0xff]   ;;  %v167_v4 = vunpack.c.0.s8 %v166_v2  ;;  %p1094_p2 = scmp.ne.s32.totalorder %s859_s14, %s1093_s0  ;;  %p1099_p4 = scmp.lt.s32.totalorder %s1093_s0, %s1093_s0 }
  0x2d   :  { %v994_v20 = vld [vmem:[%s1349_s2 + $0x30] sm:$0xff]   ;;  %v996_v22 = vld [vmem:[%s1349_s2 + $0x38] sm:$0xff]  }
  0x2e   :  { %927 = vmatpush3.bf16.msra.mxu1 %v984_v10  ;;  %v1243_v7 = vsub.s32 %v167_v4, %v169_v5  ;;  %p1100_p5 = por %p1099_p4, %p1098_p3 }
  0x2f   :  { %872 = vmatmul.mubr.msk.bf16.vlgmr.msra.gmra.mrb[0].mxu0 %vm74_vm0, %v49_v6  ;;  %928 = vmatprep.subr.bf16.mxu1 %v985_v11  ;;  %v119_v11 = vld [vmem:[%s1351_s4] ss:$8 sm:$0x3] }
  0x30   :  { %557 = vmatprep.mubr.bf16.mxu0 %v1125_v0  ;;  %p1101_p6 = pnand %p1100_p5, %p1094_p2 }
  0x32   :  { %929 = vmatpush3.bf16.msra.mxu1 %v986_v12 }
  0x33   :  { %930 = vmatprep.subr.bf16.mxu1 %v987_v13  ;;  %v1250_v13 = vsub.s32 0, %v169_v5 }
  0x36   :  { %931 = vmatpush3.bf16.msra.mxu1 %v988_v14  ;;  %v1252_v14 = vsub.s32 1, %v169_v5 }
  0x37   :  { %932 = vmatprep.subr.bf16.mxu1 %v989_v15 }
  0x3a   :  { %933 = vmatpush3.bf16.msra.mxu1 %v990_v16 }
  0x3b   :  { %934 = vmatprep.subr.bf16.mxu1 %v991_v17 }
  0x3e   :  { %935 = vmatpush3.bf16.msra.mxu1 %v992_v18 }
  0x3f   :  { %936 = vmatprep.subr.bf16.mxu1 %v993_v19 }
  0x42   :  { %937 = vmatpush3.bf16.msra.mxu1 %v994_v20 }
  0x43   :  { %938 = vmatprep.subr.bf16.mxu1 %v995_v21 }
  0x46   :  { %939 = vmatpush3.bf16.msra.mxu1 %v996_v22 }
 0x102   :  { %v1237_v23 = vpop.f32.mrb[0].mxu0 }
 0x103   :  { %v122_v24 = vrot.slane %v1237_v23, 4  ;;  %v134_v25 = vmul.f32 %v1237_v23, %v1237_v23  ;;  %v114_v26 = vpop.f32.mrb[1].mxu0 }
 0x104   :  { %v128_v27 = vrot.slane %v114_v26, 4  ;;  %v135_v28 = vmul.f32 %v114_v26, %v114_v26  ;;  %v116_v29 = vpop.f32.mrb[2].mxu0 }
 0x105   :  { %v123_v30 = vadd.f32 %v122_v24, %v1237_v23  ;;  %v136_v31 = vrot.slane %v134_v25, 4  ;;  %v117_v32 = vpop.f32.mrb[3].mxu0 }
 0x106   :  { %v129_v33 = vadd.f32 %v128_v27, %v114_v26  ;;  %v142_v34 = vrot.slane %v135_v28, 4 }
 0x107   :  { %v124_v35 = vrot.slane %v123_v30, 2  ;;  %v137_v36 = vadd.f32 %v136_v31, %v134_v25  ;;  %v873_v25 = vld [vmem:[%s1351_s4 + $0x1] ss:$8 sm:$0x3] }
 0x108   :  { %v130_v37 = vrot.slane %v129_v33, 2  ;;  %v143_v38 = vadd.f32 %v142_v34, %v135_v28 }
 0x109   :  { %v125_v39 = vadd.f32 %v124_v35, %v123_v30  ;;  %v138_v40 = vrot.slane %v137_v36, 2  ;;  %v999_v35 = vld [vmem:[#allocation5 + $0x24] ss:$8 sps:$4 sm:$0xff]  }
 0x10a   :  { %v131_v41 = vadd.f32 %v130_v37, %v129_v33  ;;  %v144_v42 = vrot.slane %v143_v38, 2  ;;  %525 = vmatprep.subr.bf16.mxu0 %v999_v35  ;;  %v1002_v37 = vld [vmem:[#allocation5 + $0x34] ss:$8 sps:$4 sm:$0xff]   ;;  %v1032_v35 = vld [vmem:[%s1350_s3 + $0x28] sm:$0xff]  }
 0x10b   :  { %v126_v43 = vrot.slane %v125_v39, 1  ;;  %v139_v44 = vadd.f32 %v138_v40, %v137_v36  ;;  %v997_v36 = vld [vmem:[#allocation5 + $0x20] ss:$8 sps:$4 sm:$0xff]  }
 0x10c   :  { %v132_v45 = vrot.slane %v131_v41, 1  ;;  %v145_v46 = vadd.f32 %v144_v42, %v143_v38  ;;  %526 = vmatpush1.bf16.msra.mxu0 %v997_v36  ;;  %v1000_v38 = vld [vmem:[#allocation5 + $0x30] ss:$8 sps:$4 sm:$0xff]   ;;  %v1003_v40 = vld [vmem:[#allocation5 + $0x40] ss:$8 sps:$4 sm:$0xff]  }
 0x10d   :  { %v127_v47 = vadd.f32 %v126_v43, %v125_v39  ;;  %v140_v48 = vrot.slane %v139_v44, 1  ;;  %527 = vmatprep.subr.bf16.mxu0 %v1002_v37  ;;  %v1005_v39 = vld [vmem:[#allocation5 + $0x44] ss:$8 sps:$4 sm:$0xff]   ;;  %v1006_v42 = vld [vmem:[#allocation5 + $0x50] ss:$8 sps:$4 sm:$0xff]  }
 0x10e   :  { %v146_v49 = vrot.slane %v145_v46, 1  ;;  %v133_v50 = vadd.f32 %v132_v45, %v131_v41  ;;  %v1008_v41 = vld [vmem:[#allocation5 + $0x54] ss:$8 sps:$4 sm:$0xff]   ;;  %v1011_v43 = vld [vmem:[#allocation5 + $0x64] ss:$8 sps:$4 sm:$0xff]  }
 0x10f   :  { %v141_v51 = vadd.f32 %v140_v48, %v139_v44  ;;  %v148_v52 = vmul.f32 0.125, %v127_v47  ;;  %v1009_v44 = vld [vmem:[#allocation5 + $0x60] ss:$8 sps:$4 sm:$0xff]   ;;  %v1014_v45 = vld [vmem:[#allocation5 + $0x74] ss:$8 sps:$4 sm:$0xff]  }
 0x110   :  { %v147_v53 = vadd.f32 %v146_v49, %v145_v46  ;;  %v149_v54 = vmul.f32 0.125, %v133_v50  ;;  %528 = vmatpush1.bf16.msra.mxu0 %v1000_v38  ;;  %v1012_v46 = vld [vmem:[#allocation5 + $0x70] ss:$8 sps:$4 sm:$0xff]   ;;  %v1015_v47 = vld [vmem:[#allocation5 + $0x80] ss:$8 sps:$4 sm:$0xff]  }
 0x111   :  { %v150_v55 = vmul.f32 0.125, %v141_v51  ;;  %v152_v56 = vmul.f32 %v148_v52, %v148_v52  ;;  %529 = vmatprep.subr.bf16.mxu0 %v1005_v39  ;;  %v1017_v48 = vld [vmem:[#allocation5 + $0x84] ss:$8 sps:$4 sm:$0xff]   ;;  %v1020_v49 = vld [vmem:[#allocation5 + $0x94] ss:$8 sps:$4 sm:$0xff]  }
 0x112   :  { %v151_v57 = vmul.f32 0.125, %v147_v53  ;;  %v153_v58 = vmul.f32 %v149_v54, %v149_v54  ;;  %v1018_v50 = vld [vmem:[#allocation5 + $0x90] ss:$8 sps:$4 sm:$0xff]   ;;  %v1033_v36 = vld [vmem:[%s1350_s3 + $0x70] sm:$0xff]  }
 0x113   :  { %v154_v59 = vsub.f32 %v150_v55, %v152_v56  ;;  %v1034_v37 = vld [vmem:[%s1350_s3 + $0x30] sm:$0xff]   ;;  %v1035_v38 = vld [vmem:[%s1350_s3 + $0x78] sm:$0xff]  }
 0x114   :  { %v155_v60 = vsub.f32 %v151_v57, %v153_v58  ;;  %530 = vmatpush1.bf16.msra.mxu0 %v1003_v40  ;;  %v1036_v39 = vld [vmem:[%s1350_s3 + $0x38] sm:$0xff]  }
 0x115   :  { %v156_v61 = vmax.f32 %v154_v59, 0.0  ;;  %531 = vmatprep.subr.bf16.mxu0 %v1008_v41 }
 0x116   :  { %v157_v62 = vmax.f32 %v155_v60, 0.0 }
 0x117   :  { %v158_v63 = vadd.f32 1e-05, %v156_v61 }
 0x118   :  { %v159_v0 = vadd.f32 1e-05, %v157_v62  ;;  %532 = vmatpush1.bf16.msra.mxu0 %v1006_v42 }
 0x119   :  { %1037 = vrsqrt.f32 %v158_v63  ;;  %533 = vmatprep.subr.bf16.mxu0 %v1011_v43 }
 0x11a   :  { %1039 = vrsqrt.f32 %v159_v0 }
 0x11c   :  { %534 = vmatpush1.bf16.msra.mxu0 %v1009_v44 }
 0x11d   :  { %535 = vmatprep.subr.bf16.mxu0 %v1014_v45 }
 0x120   :  { %536 = vmatpush1.bf16.msra.mxu0 %v1012_v46 }
 0x121   :  { %537 = vmatprep.subr.bf16.mxu0 %v1017_v48 }
 0x123   :  { %v1038_v6 = vpop.eup %1037 }
 0x124   :  { %v1040_v8 = vpop.eup %1039  ;;  %538 = vmatpush1.bf16.msra.mxu0 %v1015_v47 }
 0x125   :  { %v164_v9 = vcombine.low %v1038_v6, %v1040_v8  ;;  %539 = vmatprep.subr.bf16.mxu0 %v1020_v49 }
 0x127   :  { %v171_v10 = vrot.slane %v164_v9, %v1243_v7 }
 0x128   :  { %540 = vmatpush1.bf16.msra.mxu0 %v1018_v50 }
 0x129   :  { %v178_v12 = vrot.slane %v171_v10, %v1243_v7 }
 0x12b   :  { %v180_v15 = vmul.f32 %v178_v12, %v119_v11  ;;  %v400_v12 = vld [vmem:[%s1351_s4 + $0x2] ss:$0 sm:$0xff] }
 0x12d   :  { %v185_v16 = vrot.slane %v180_v15, %v1250_v13  ;;  %v189_v17 = vrot.slane %v180_v15, %v1252_v14 }
 0x12f   :  { %v192_v18 = vmul.f32 %v185_v16, %v148_v52  ;;  %v193_v19 = vmul.f32 %v189_v17, %v149_v54  ;;  %v214_v20 = vmul.f32 %v189_v17, %v114_v26  ;;  %v213_v21 = vmul.f32 %v185_v16, %v1237_v23  ;;  %v401_v17 = vld [vmem:[%s1351_s4 + $0x3] ss:$0 sm:$0xff] }
 0x131   :  { %v196_v22 = vcombine.low %v192_v18, %v193_v19 }
 0x133   :  { %v203_v24 = vrot.slane %v196_v22, %v1243_v7 }
 0x135   :  { %v210_v27 = vrot.slane %v203_v24, %v1243_v7 }
 0x137   :  { %v212_v28 = vsub.f32 %v873_v25, %v210_v27  ;;  %v1021_v25 = vld [vmem:[%s1350_s3 + $0x40] sm:$0xff]  }
 0x138   :  { %v1022_v27 = vld [vmem:[%s1350_s3] sm:$0xff]   ;;  %946 = vmatprep.subr.bf16.mxu1 %v1021_v25 }
 0x139   :  { %v223_v29 = vrot.slane %v212_v28, %v1252_v14  ;;  %v219_v30 = vrot.slane %v212_v28, %v1250_v13  ;;  %v1023_v28 = vld [vmem:[%s1350_s3 + $0x48] sm:$0xff]  }
 0x13b   :  { %v227_v31 = vadd.f32 %v223_v29, %v214_v20  ;;  %v226_v32 = vadd.f32 %v219_v30, %v213_v21  ;;  %v1024_v29 = vld [vmem:[%s1350_s3 + $0x8] sm:$0xff]   ;;  %v1025_v30 = vld [vmem:[%s1350_s3 + $0x50] sm:$0xff]  }
 0x13d   :  { %v229_v33 = vmax.f32 %v227_v31, 0.0  ;;  %v228_v26 = vmax.f32 %v226_v32, 0.0  ;;  %v1026_v31 = vld [vmem:[%s1350_s3 + $0x10] sm:$0xff]   ;;  %v1027_v32 = vld [vmem:[%s1350_s3 + $0x58] sm:$0xff]  }
 0x13f   :  { %v231_v34 = vpack.c.bf16 %v229_v33, %v229_v33  ;;  %v230_v23 = vpack.c.bf16 %v228_v26, %v228_v26  ;;  %v1028_v33 = vld [vmem:[%s1350_s3 + $0x18] sm:$0xff]   ;;  %v1029_v26 = vld [vmem:[%s1350_s3 + $0x60] sm:$0xff]  }
 0x141   :  { %392 = vmatprep.mubr.bf16.mxu1 %v231_v34  ;;  %v1030_v34 = vld [vmem:[%s1350_s3 + $0x20] sm:$0xff]  }
 0x142   :  { %393 = vmatmul.mubr.bf16.vlgmr.msra.gmra.mrb[0].mxu1 %v230_v23  ;;  %v1031_v23 = vld [vmem:[%s1350_s3 + $0x68] sm:$0xff]  }
 0x143   :  { %947 = vmatpush3.bf16.msra.mxu1 %v1022_v27  ;;  %v906_v27 = vld [vmem:[%s1351_s4 + $0x4] ss:$8 sm:$0x3] }
 0x144   :  { %948 = vmatprep.subr.bf16.mxu1 %v1023_v28 }
 0x147   :  { %949 = vmatpush3.bf16.msra.mxu1 %v1024_v29 }
 0x148   :  { %950 = vmatprep.subr.bf16.mxu1 %v1025_v30 }
 0x14b   :  { %951 = vmatpush3.bf16.msra.mxu1 %v1026_v31 }
 0x14c   :  { %952 = vmatprep.subr.bf16.mxu1 %v1027_v32 }
 0x14f   :  { %953 = vmatpush3.bf16.msra.mxu1 %v1028_v33 }
 0x150   :  { %954 = vmatprep.subr.bf16.mxu1 %v1029_v26 }
 0x153   :  { %955 = vmatpush3.bf16.msra.mxu1 %v1030_v34 }
 0x154   :  { %956 = vmatprep.subr.bf16.mxu1 %v1031_v23 }
 0x157   :  { %957 = vmatpush3.bf16.msra.mxu1 %v1032_v35 }
 0x158   :  { %958 = vmatprep.subr.bf16.mxu1 %v1033_v36  ;;  %v907_v36 = vld [vmem:[%s1351_s4 + $0x5] ss:$8 sm:$0x3] }
 0x15b   :  { %959 = vmatpush3.bf16.msra.mxu1 %v1034_v37 }
 0x15c   :  { %960 = vmatprep.subr.bf16.mxu1 %v1035_v38 }
 0x15f   :  { %961 = vmatpush3.bf16.msra.mxu1 %v1036_v39 }
 0x215   :  { %v940_v51 = vpop.f32.mrb[0].mxu1 }
 0x216   :  { %v941_v52 = vpop.f32.mrb[1].mxu1 }
 0x217   :  { %v942_v53 = vadd.f32 %v941_v52, %v940_v51  ;;  %v943_v54 = vpop.f32.mrb[2].mxu1 }
 0x218   :  { %v944_v55 = vpop.f32.mrb[3].mxu1 }
 0x219   :  { %v402_v56 = vrot.slane %v942_v53, 4  ;;  %v408_v57 = vmul.f32 %v942_v53, %v942_v53 }
 0x21b   :  { %v403_v58 = vadd.f32 %v942_v53, %v402_v56  ;;  %v409_v59 = vrot.slane %v408_v57, 4 }
 0x21d   :  { %v404_v60 = vrot.slane %v403_v58, 2  ;;  %v410_v61 = vadd.f32 %v409_v59, %v408_v57 }
 0x21f   :  { %v405_v62 = vadd.f32 %v404_v60, %v403_v58  ;;  %v411_v63 = vrot.slane %v410_v61, 2 }
 0x221   :  { %v406_v0 = vrot.slane %v405_v62, 1  ;;  %v412_v1 = vadd.f32 %v411_v63, %v410_v61 }
 0x223   :  { %v407_v2 = vadd.f32 %v406_v0, %v405_v62  ;;  %v413_v3 = vrot.slane %v412_v1, 1 }
 0x225   :  { %v414_v4 = vadd.f32 %v413_v3, %v412_v1  ;;  %v415_v5 = vmul.f32 0.125, %v407_v2 }
 0x227   :  { %v416_v6 = vmul.f32 0.125, %v414_v4  ;;  %v417_v8 = vmul.f32 %v415_v5, %v415_v5 }
 0x229   :  { %v418_v9 = vsub.f32 %v416_v6, %v417_v8 }
 0x22b   :  { %v419_v10 = vmax.f32 %v418_v9, 0.0 }
 0x22d   :  { %v420_v11 = vadd.f32 1e-05, %v419_v10 }
 0x22f   :  { %1041 = vrsqrt.f32 %v420_v11 }
 0x239   :  { %v1042_v15 = vpop.eup %1041 }
 0x23a   :  { %v422_v16 = vmul.f32 %v1042_v15, %v400_v12 }
 0x23c   :  { %v423_v18 = vmul.f32 %v422_v16, %v415_v5  ;;  %v425_v19 = vmul.f32 %v942_v53, %v422_v16 }
 0x23e   :  { %v424_v20 = vsub.f32 %v401_v17, %v423_v18 }
 0x240   :  { %v426_v21 = vadd.f32 %v425_v19, %v424_v20 }
 0x242   :  { %v427_v22 = vmax.f32 %v426_v21, 0.0 }
 0x244   :  { %v428_v24 = vpack.c.bf16 %v427_v22, %v427_v22 }
 0x246   :  { %558 = vmatmul.mubr.bf16.vlgmr.msra.gmra.mrb[4].mxu0 %v428_v24 }
 0x319   :  { %v559_v40 = vpop.f32.mrb[4].mxu0 }
 0x31a   :  { %v570_v41 = vrot.slane %v559_v40, 4  ;;  %v582_v42 = vmul.f32 %v559_v40, %v559_v40  ;;  %v561_v43 = vpop.f32.mrb[5].mxu0 }
 0x31b   :  { %v576_v44 = vrot.slane %v561_v43, 4  ;;  %v583_v45 = vmul.f32 %v561_v43, %v561_v43  ;;  %v563_v46 = vpop.f32.mrb[6].mxu0 }
 0x31c   :  { %v571_v47 = vadd.f32 %v570_v41, %v559_v40  ;;  %v584_v48 = vrot.slane %v582_v42, 4  ;;  %v564_v49 = vpop.f32.mrb[7].mxu0 }
 0x31d   :  { %v577_v50 = vadd.f32 %v576_v44, %v561_v43  ;;  %v590_v51 = vrot.slane %v583_v45, 4 }
 0x31e   :  { %v572_v52 = vrot.slane %v571_v47, 2  ;;  %v585_v53 = vadd.f32 %v584_v48, %v582_v42  ;;  %v712_v48 = vld [vmem:[%s1351_s4 + $0x6] ss:$0 sm:$0xff] }
 0x31f   :  { %v578_v54 = vrot.slane %v577_v50, 2  ;;  %v591_v55 = vadd.f32 %v590_v51, %v583_v45 }
 0x320   :  { %v573_v56 = vadd.f32 %v572_v52, %v571_v47  ;;  %v586_v57 = vrot.slane %v585_v53, 2 }
 0x321   :  { %v579_v58 = vadd.f32 %v578_v54, %v577_v50  ;;  %v592_v59 = vrot.slane %v591_v55, 2 }
 0x322   :  { %v574_v60 = vrot.slane %v573_v56, 1  ;;  %v587_v61 = vadd.f32 %v586_v57, %v585_v53 }
 0x323   :  { %v580_v62 = vrot.slane %v579_v58, 1  ;;  %v593_v63 = vadd.f32 %v592_v59, %v591_v55 }
 0x324   :  { %v575_v0 = vadd.f32 %v574_v60, %v573_v56  ;;  %v588_v1 = vrot.slane %v587_v61, 1 }
 0x325   :  { %v581_v2 = vadd.f32 %v580_v62, %v579_v58  ;;  %v594_v3 = vrot.slane %v593_v63, 1 }
 0x326   :  { %v589_v4 = vadd.f32 %v588_v1, %v587_v61  ;;  %v596_v5 = vmul.f32 0.125, %v575_v0 }
 0x327   :  { %v595_v6 = vadd.f32 %v594_v3, %v593_v63  ;;  %v597_v8 = vmul.f32 0.125, %v581_v2 }
 0x328   :  { %v598_v9 = vmul.f32 0.125, %v589_v4  ;;  %v600_v10 = vmul.f32 %v596_v5, %v596_v5 }
 0x329   :  { %v599_v11 = vmul.f32 0.125, %v595_v6  ;;  %v601_v12 = vmul.f32 %v597_v8, %v597_v8 }
 0x32a   :  { %v602_v15 = vsub.f32 %v598_v9, %v600_v10 }
 0x32b   :  { %v603_v16 = vsub.f32 %v599_v11, %v601_v12 }
 0x32c   :  { %v604_v17 = vmax.f32 %v602_v15, 0.0 }
 0x32d   :  { %v605_v18 = vmax.f32 %v603_v16, 0.0 }
 0x32e   :  { %v606_v19 = vadd.f32 1e-05, %v604_v17 }
 0x32f   :  { %v607_v20 = vadd.f32 1e-05, %v605_v18 }
 0x330   :  { %1043 = vrsqrt.f32 %v606_v19 }
 0x331   :  { %1045 = vrsqrt.f32 %v607_v20 }
 0x33a   :  { %v1044_v21 = vpop.eup %1043 }
 0x33b   :  { %v1046_v22 = vpop.eup %1045 }
 0x33c   :  { %v612_v24 = vcombine.low %v1044_v21, %v1046_v22 }
 0x33e   :  { %v619_v25 = vrot.slane %v612_v24, %v1243_v7 }
 0x340   :  { %v626_v28 = vrot.slane %v619_v25, %v1243_v7 }
 0x342   :  { %v628_v29 = vmul.f32 %v906_v27, %v626_v28 }
 0x344   :  { %v633_v30 = vrot.slane %v628_v29, %v1250_v13  ;;  %v637_v31 = vrot.slane %v628_v29, %v1252_v14 }
 0x346   :  { %v640_v32 = vmul.f32 %v633_v30, %v596_v5  ;;  %v641_v33 = vmul.f32 %v637_v31, %v597_v8  ;;  %v662_v26 = vmul.f32 %v637_v31, %v561_v43  ;;  %v661_v34 = vmul.f32 %v633_v30, %v559_v40 }
 0x348   :  { %v644_v23 = vcombine.low %v640_v32, %v641_v33 }
 0x34a   :  { %v651_v35 = vrot.slane %v644_v23, %v1243_v7 }
 0x34c   :  { %v658_v37 = vrot.slane %v651_v35, %v1243_v7 }
 0x34e   :  { %v660_v38 = vsub.f32 %v907_v36, %v658_v37 }
 0x350   :  { %v671_v39 = vrot.slane %v660_v38, %v1252_v14  ;;  %v667_v41 = vrot.slane %v660_v38, %v1250_v13 }
 0x352   :  { %v675_v42 = vadd.f32 %v671_v39, %v662_v26  ;;  %v674_v44 = vadd.f32 %v667_v41, %v661_v34 }
 0x354   :  { %v677_v45 = vmax.f32 %v675_v42, 0.0  ;;  %v676_v46 = vmax.f32 %v674_v44, 0.0 }
 0x356   :  { %v679_v43 = vpack.c.bf16 %v677_v45, %v677_v45  ;;  %v678_v40 = vpack.c.bf16 %v676_v46, %v676_v46 }
 0x358   :  { %841 = vmatprep.mubr.bf16.mxu1 %v679_v43 }
 0x359   :  { %842 = vmatmul.mubr.bf16.vlgmr.msra.gmra.mrb[4].mxu1 %v678_v40 }
 0x42c   :  { %v962_v47 = vpop.f32.mrb[4].mxu1 }
 0x42d   :  { %v963_v49 = vpop.f32.mrb[5].mxu1 }
 0x42e   :  { %v964_v7 = vadd.f32 %v963_v49, %v962_v47  ;;  %v965_v50 = vpop.f32.mrb[6].mxu1 }
 0x42f   :  { %v966_v51 = vpop.f32.mrb[7].mxu1 }
 0x430   :  { %v844_v14 = vadd.f32 %v964_v7, %v712_v48 }
 0x432   :  { %1047 = vtanh.f32 %v844_v14 }
 0x43c   :  { %v1048_v13 = vpop.eup %1047 }
 0x43d   :  { %851 = vst.msk [vmem:[#allocation7] sm:$0xff] %vm850_vm1, %v1048_v13 }
 0x43e   :  { %1104 = shalt.err (!%p1101_p6)
}
 0x43f   :  { %s1105_s16 = scalar_lea.hbm %s1352_s5, 128 }
 0x440   :  { %p1106_p7 = scmp.ne.s32.totalorder %s1352_s5, %s1105_s16  ;;  %p1109_p8 = scmp.lt.u32.totalorder %s1105_s16, %s1352_s5 }
 0x442   :  { %p1111_p9 = pnand %p1109_p8, %p1106_p7 }
 0x444   :  { %1114 = shalt.err (!%p1111_p9)
}
 0x445   :  { %861 = dma.vmem_to_hbm [thread:$0]  %s859_s14, 128, %s1352_s5, [#allocation4]  }
 0x446   :  { %1119 = dma.done.wait [#allocation4], 128  }
 0x447   :  { %1120 = vsyncadd [#allocation4], 4294967168 }
 0x448   :  { %865 = vsyncpa [#allocation3], 1 }
 0x449   :  { %866 = vsyncpa [#allocation6], 1 }
 0x44a   :  { %867 = vsyncpa [#allocation4], 1 }

</bundles_post_ra>
